<compile_context>
chip_gen: v7x
topology: tpu7x:2x2x1
jax: 0.10.0
libtpu: 0.0.40
codegen_flags: <defaults>
</compile_context>

<pallas_src>
import jax
import jax.numpy as jnp
from jax.experimental import pallas as pl
from jax.experimental.pallas import tpu as pltpu

_LANES = 128
_SUBLANES = 8
# In-flight VMEM budget (pipeline buffers + elementwise temporaries); sized to
# fit v7x's 64 MiB physical VMEM with headroom (v5e/v6e have 128 MiB).
_VMEM_BUDGET_BYTES = 36 * 1024 * 1024
_VMEM_LIMIT_BYTES = 48 * 1024 * 1024


def _round_up(x, m):
    return ((x + m - 1) // m) * m


def _physics_loss_kernel(pred_ref, clean_ref, noisy_ref, out_ref):
    """Per-tile raw partial sums for the four loss terms."""
    pred = pred_ref[...].astype(jnp.float32)
    clean = clean_ref[...].astype(jnp.float32)
    noisy = noisy_ref[...].astype(jnp.float32)
    L = pred.shape[-1]

    # ---- residual, shared by MSE / smooth / peak terms ----
    e = pred - clean
    s_mse = jnp.sum(e * e)

    # ---- smoothness: L1 of first differences; diff(pred)-diff(clean)==diff(e)
    d1_e = e[:, 1:] - e[:, :-1]
    s_smooth = jnp.sum(jnp.abs(d1_e))

    # ---- peak: mask from second difference of clean ----
    d1_c = clean[:, 1:] - clean[:, :-1]
    d2_c = d1_c[:, 1:] - d1_c[:, :-1]
    peak_mask = (d2_c < 0.0).astype(jnp.float32)
    pe = e[:, 1:-1] * peak_mask          # (p*m - c*m) == (p - c)*m
    s_peak = jnp.sum(pe * pe)

    # ---- Poisson-like term, one-pass unbiased (ddof=1) variance per row ----
    n = noisy - clean
    nn = n * n
    rsum = jnp.sum(n, axis=-1, keepdims=True)
    rss = jnp.sum(nn, axis=-1, keepdims=True)
    var = (rss - rsum * rsum * (1.0 / L)) / (L - 1)
    pr = nn - var
    s_poisson = jnp.sum(pr * pr)

    # Pack the 4 raw partial sums into this step's (1, 8, 128) output block
    # (lane 0..3 of sublane 0 is what the wrapper reads).
    lane = jax.lax.broadcasted_iota(jnp.int32, out_ref.shape, 2)
    out_ref[...] = jnp.where(lane == 0, s_mse,
                   jnp.where(lane == 1, s_smooth,
                   jnp.where(lane == 2, s_peak,
                   jnp.where(lane == 3, s_poisson, 0.0))))


def physics_aware_loss(pred, clean, noisy, alpha=0.1, beta=0.05, gamma=0.01,
                       block_rows=None):
    """pred/clean/noisy: [B, C, L] float arrays -> scalar float32 loss."""
    B, C, L = pred.shape
    R = B * C
    pred2 = pred.reshape(R, L)
    clean2 = clean.reshape(R, L)
    noisy2 = noisy.reshape(R, L)

    itemsize = jnp.dtype(pred.dtype).itemsize

    # Pick the row tile: largest multiple-of-8 tile whose double-buffered
    # input pipeline (3 arrays x 2 buffers) plus f32 temporaries fits the
    # VMEM budget.
    if block_rows is None:
        bytes_per_row = (3 * 2 * itemsize + 6 * 4) * L
        tr = (_VMEM_BUDGET_BYTES // max(bytes_per_row, 1)) // _SUBLANES * _SUBLANES
        tr = max(_SUBLANES, min(tr, 1024))
    else:
        tr = max(_SUBLANES, (block_rows // _SUBLANES) * _SUBLANES)
    tr = min(tr, _round_up(R, _SUBLANES))

    # Zero-pad rows to a multiple of the tile (zero rows contribute 0 to all
    # partial sums, so no row mask is needed; divisors below use the true R).
    r_pad = _round_up(R, tr)
    if r_pad != R:
        pad = ((0, r_pad - R), (0, 0))
        pred2 = jnp.pad(pred2, pad)
        clean2 = jnp.pad(clean2, pad)
        noisy2 = jnp.pad(noisy2, pad)
    grid = r_pad // tr

    grid_spec = pltpu.PrefetchScalarGridSpec(
        num_scalar_prefetch=0,
        grid=(grid,),
        in_specs=[pl.BlockSpec((tr, L), lambda i: (i, 0)) for _ in range(3)],
        out_specs=pl.BlockSpec((1, _SUBLANES, _LANES), lambda i: (i, 0, 0)),
    )

    partials = pl.pallas_call(
        _physics_loss_kernel,
        out_shape=jax.ShapeDtypeStruct((grid, _SUBLANES, _LANES), jnp.float32),
        grid_spec=grid_spec,
        compiler_params=pltpu.CompilerParams(
            dimension_semantics=("parallel",),
            vmem_limit_bytes=_VMEM_LIMIT_BYTES,
        ),
        cost_estimate=pl.CostEstimate(
            flops=int(20 * r_pad * L),
            transcendentals=0,
            bytes_accessed=int(3 * r_pad * L * itemsize
                               + grid * _SUBLANES * _LANES * 4),
        ),
    )(pred2, clean2, noisy2)

    # Finalize: sum raw partials across tiles, divide by GLOBAL element counts
    # (summing per-tile means would be wrong once tiled).
    sums = jnp.sum(partials[:, 0, :4], axis=0)
    mse_loss = sums[0] / (R * L)
    smooth_loss = sums[1] / (R * (L - 1))
    peak_loss = sums[2] / (R * (L - 2))
    poisson_loss = sums[3] / (R * L)
    return (mse_loss + alpha * smooth_loss + beta * peak_loss
            + gamma * poisson_loss)


def _reference_loss(pred, clean, noisy, alpha=0.1, beta=0.05, gamma=0.01):
    # pure-JAX reference mirroring the PyTorch module semantics
    pred = pred.astype(jnp.float32)
    clean = clean.astype(jnp.float32)
    noisy = noisy.astype(jnp.float32)
    mse = jnp.mean((pred - clean) ** 2)
    d1p = jnp.diff(pred, axis=-1)
    d1c = jnp.diff(clean, axis=-1)
    smooth = jnp.mean(jnp.abs(d1p - d1c))
    d2c = jnp.diff(clean, n=2, axis=-1)
    mask = (d2c < 0).astype(jnp.float32)
    peak = jnp.mean((pred[:, :, 1:-1] * mask - clean[:, :, 1:-1] * mask) ** 2)
    noise = noisy - clean
    var = jnp.var(noise, axis=-1, keepdims=True, ddof=1)
    poisson = jnp.mean((noise ** 2 - var) ** 2)
    return mse + alpha * smooth + beta * peak + gamma * poisson


if __name__ == "__main__":
    key = jax.random.PRNGKey(0)

    # Test 1: module-sized shapes, single tile.
    B, C, L = 2, 4, 16
    k1, k2, k3, k4 = jax.random.split(key, 4)
    clean = jax.random.normal(k1, (B, C, L), dtype=jnp.float32)
    noisy = clean + 0.1 * jax.random.normal(k2, (B, C, L), dtype=jnp.float32)
    pred = clean + 0.05 * jax.random.normal(k3, (B, C, L), dtype=jnp.float32)

    loss = jax.block_until_ready(physics_aware_loss(pred, clean, noisy))
    ref = jax.block_until_ready(_reference_loss(pred, clean, noisy))
    assert jnp.allclose(loss, ref, rtol=1e-5, atol=1e-6), (loss, ref)

    # Test 2: exercise the multi-tile streaming path + row padding
    # (R = 15, TR = 8 -> 2 grid steps, 1 zero-padded row).
    B2, C2, L2 = 3, 5, 16
    c2k, n2k, p2k = jax.random.split(k4, 3)
    clean_b = jax.random.normal(c2k, (B2, C2, L2), dtype=jnp.float32)
    noisy_b = clean_b + 0.1 * jax.random.normal(n2k, (B2, C2, L2), dtype=jnp.float32)
    pred_b = clean_b + 0.05 * jax.random.normal(p2k, (B2, C2, L2), dtype=jnp.float32)

    loss2 = jax.block_until_ready(
        physics_aware_loss(pred_b, clean_b, noisy_b, block_rows=8))
    ref2 = jax.block_until_ready(_reference_loss(pred_b, clean_b, noisy_b))
    assert jnp.allclose(loss2, ref2, rtol=1e-5, atol=1e-6), (loss2, ref2)

    print("KERNEL_OK")
</pallas_src>

<mosaic_0001>
module attributes {stable_mosaic.version = 11 : i64} {
  func.func @_physics_loss_kernel(%arg0: i32, %arg1: memref<8x16xf32, #tpu.memory_space<vmem>>, %arg2: memref<8x16xf32, #tpu.memory_space<vmem>>, %arg3: memref<8x16xf32, #tpu.memory_space<vmem>>, %arg4: memref<1x8x128xf32, #tpu.memory_space<vmem>>) attributes {dimension_semantics = [#tpu.dimension_semantics<parallel>], iteration_bounds = array<i64: 1>, scalar_prefetch = 0 : i64, scratch_operands = 0 : i64, tpu.core_type = #tpu.core_type<tc>, window_params = [{transform_indices = @transform_0, window_bounds = array<i64: 8, 16>}, {transform_indices = @transform_1, window_bounds = array<i64: 8, 16>}, {transform_indices = @transform_2, window_bounds = array<i64: 8, 16>}, {transform_indices = @transform_3, window_bounds = array<i64: 1, 8, 128>}]} {
    %c0 = arith.constant 0 : index
    %c0_0 = arith.constant 0 : index
    %0 = vector.load %arg1[%c0, %c0_0] : memref<8x16xf32, #tpu.memory_space<vmem>>, vector<8x16xf32>
    %c0_1 = arith.constant 0 : index
    %c0_2 = arith.constant 0 : index
    %1 = vector.load %arg2[%c0_1, %c0_2] : memref<8x16xf32, #tpu.memory_space<vmem>>, vector<8x16xf32>
    %c0_3 = arith.constant 0 : index
    %c0_4 = arith.constant 0 : index
    %2 = vector.load %arg3[%c0_3, %c0_4] : memref<8x16xf32, #tpu.memory_space<vmem>>, vector<8x16xf32>
    %3 = arith.subf %0, %1 : vector<8x16xf32>
    %4 = arith.mulf %3, %3 : vector<8x16xf32>
    %5 = vector.shape_cast %4 : vector<8x16xf32> to vector<1x8x16xf32>
    %cst = arith.constant dense<0.000000e+00> : vector<1xf32>
    %6 = vector.multi_reduction <add>, %5, %cst [1, 2] : vector<1x8x16xf32> to vector<1xf32>
    %7 = vector.shape_cast %6 : vector<1xf32> to vector<1x1x1xf32>
    %8 = vector.extract %7[0, 0, 0] : f32 from vector<1x1x1xf32>
    %9 = vector.extract_strided_slice %3 {offsets = [0, 1], sizes = [8, 15], strides = [1, 1]} : vector<8x16xf32> to vector<8x15xf32>
    %10 = vector.extract_strided_slice %3 {offsets = [0, 0], sizes = [8, 15], strides = [1, 1]} : vector<8x16xf32> to vector<8x15xf32>
    %11 = arith.subf %9, %10 : vector<8x15xf32>
    %12 = math.absf %11 : vector<8x15xf32>
    %13 = vector.shape_cast %12 : vector<8x15xf32> to vector<1x8x15xf32>
    %cst_5 = arith.constant dense<0.000000e+00> : vector<1xf32>
    %14 = vector.multi_reduction <add>, %13, %cst_5 [1, 2] : vector<1x8x15xf32> to vector<1xf32>
    %15 = vector.shape_cast %14 : vector<1xf32> to vector<1x1x1xf32>
    %16 = vector.extract %15[0, 0, 0] : f32 from vector<1x1x1xf32>
    %17 = vector.extract_strided_slice %1 {offsets = [0, 1], sizes = [8, 15], strides = [1, 1]} : vector<8x16xf32> to vector<8x15xf32>
    %18 = vector.extract_strided_slice %1 {offsets = [0, 0], sizes = [8, 15], strides = [1, 1]} : vector<8x16xf32> to vector<8x15xf32>
    %19 = arith.subf %17, %18 : vector<8x15xf32>
    %20 = vector.extract_strided_slice %19 {offsets = [0, 1], sizes = [8, 14], strides = [1, 1]} : vector<8x15xf32> to vector<8x14xf32>
    %21 = vector.extract_strided_slice %19 {offsets = [0, 0], sizes = [8, 14], strides = [1, 1]} : vector<8x15xf32> to vector<8x14xf32>
    %22 = arith.subf %20, %21 : vector<8x14xf32>
    %cst_6 = arith.constant 0.000000e+00 : f32
    %23 = vector.broadcast %cst_6 : f32 to vector<8x14xf32>
    %24 = arith.cmpf olt, %22, %23 : vector<8x14xf32>
    %25 = arith.extui %24 : vector<8x14xi1> to vector<8x14xi32>
    %26 = arith.sitofp %25 : vector<8x14xi32> to vector<8x14xf32>
    %27 = vector.extract_strided_slice %3 {offsets = [0, 1], sizes = [8, 14], strides = [1, 1]} : vector<8x16xf32> to vector<8x14xf32>
    %28 = arith.mulf %27, %26 : vector<8x14xf32>
    %29 = arith.mulf %28, %28 : vector<8x14xf32>
    %30 = vector.shape_cast %29 : vector<8x14xf32> to vector<1x8x14xf32>
    %cst_7 = arith.constant dense<0.000000e+00> : vector<1xf32>
    %31 = vector.multi_reduction <add>, %30, %cst_7 [1, 2] : vector<1x8x14xf32> to vector<1xf32>
    %32 = vector.shape_cast %31 : vector<1xf32> to vector<1x1x1xf32>
    %33 = vector.extract %32[0, 0, 0] : f32 from vector<1x1x1xf32>
    %34 = arith.subf %2, %1 : vector<8x16xf32>
    %35 = arith.mulf %34, %34 : vector<8x16xf32>
    %cst_8 = arith.constant dense<0.000000e+00> : vector<8xf32>
    %36 = vector.multi_reduction <add>, %34, %cst_8 [1] : vector<8x16xf32> to vector<8xf32>
    %37 = vector.shape_cast %36 : vector<8xf32> to vector<8x1xf32>
    %cst_9 = arith.constant dense<0.000000e+00> : vector<8xf32>
    %38 = vector.multi_reduction <add>, %35, %cst_9 [1] : vector<8x16xf32> to vector<8xf32>
    %39 = vector.shape_cast %38 : vector<8xf32> to vector<8x1xf32>
    %40 = arith.mulf %37, %37 : vector<8x1xf32>
    %cst_10 = arith.constant 6.250000e-02 : f32
    %41 = vector.broadcast %cst_10 : f32 to vector<8x1xf32>
    %42 = arith.mulf %40, %41 : vector<8x1xf32>
    %43 = arith.subf %39, %42 : vector<8x1xf32>
    %cst_11 = arith.constant 1.500000e+01 : f32
    %44 = vector.broadcast %cst_11 : f32 to vector<8x1xf32>
    %45 = arith.divf %43, %44 : vector<8x1xf32>
    %46 = vector.broadcast %45 : vector<8x1xf32> to vector<8x16xf32>
    %47 = arith.subf %35, %46 : vector<8x16xf32>
    %48 = arith.mulf %47, %47 : vector<8x16xf32>
    %49 = vector.shape_cast %48 : vector<8x16xf32> to vector<1x8x16xf32>
    %cst_12 = arith.constant dense<0.000000e+00> : vector<1xf32>
    %50 = vector.multi_reduction <add>, %49, %cst_12 [1, 2] : vector<1x8x16xf32> to vector<1xf32>
    %51 = vector.shape_cast %50 : vector<1xf32> to vector<1x1x1xf32>
    %52 = vector.extract %51[0, 0, 0] : f32 from vector<1x1x1xf32>
    %53 = tpu.iota {dimensions = array<i32: 2>} : vector<1x8x128xi32>
    %c0_i32 = arith.constant 0 : i32
    %54 = vector.broadcast %c0_i32 : i32 to vector<1x8x128xi32>
    %55 = arith.cmpi eq, %53, %54 : vector<1x8x128xi32>
    %c1_i32 = arith.constant 1 : i32
    %56 = vector.broadcast %c1_i32 : i32 to vector<1x8x128xi32>
    %57 = arith.cmpi eq, %53, %56 : vector<1x8x128xi32>
    %c2_i32 = arith.constant 2 : i32
    %58 = vector.broadcast %c2_i32 : i32 to vector<1x8x128xi32>
    %59 = arith.cmpi eq, %53, %58 : vector<1x8x128xi32>
    %c3_i32 = arith.constant 3 : i32
    %60 = vector.broadcast %c3_i32 : i32 to vector<1x8x128xi32>
    %61 = arith.cmpi eq, %53, %60 : vector<1x8x128xi32>
    %cst_13 = arith.constant 0.000000e+00 : f32
    %62 = vector.broadcast %52 : f32 to vector<1x8x128xf32>
    %63 = vector.broadcast %cst_13 : f32 to vector<1x8x128xf32>
    %64 = arith.select %61, %62, %63 : vector<1x8x128xi1>, vector<1x8x128xf32>
    %65 = vector.broadcast %33 : f32 to vector<1x8x128xf32>
    %66 = arith.select %59, %65, %64 : vector<1x8x128xi1>, vector<1x8x128xf32>
    %67 = vector.broadcast %16 : f32 to vector<1x8x128xf32>
    %68 = arith.select %57, %67, %66 : vector<1x8x128xi1>, vector<1x8x128xf32>
    %69 = vector.broadcast %8 : f32 to vector<1x8x128xf32>
    %70 = arith.select %55, %69, %68 : vector<1x8x128xi1>, vector<1x8x128xf32>
    %c0_14 = arith.constant 0 : index
    %c0_15 = arith.constant 0 : index
    %c0_16 = arith.constant 0 : index
    %71 = vector.load %arg4[%c0_14, %c0_15, %c0_16] : memref<1x8x128xf32, #tpu.memory_space<vmem>>, vector<1x8x128xf32>
    tpu.vector_store %arg4[%c0_14, %c0_15, %c0_16], %70 {strides = array<i32>} : memref<1x8x128xf32, #tpu.memory_space<vmem>>, vector<1x8x128xf32>,
    return
  }
  func.func @transform_0(%arg0: i32) -> (i32, i32) {
    %c0_i32 = arith.constant 0 : i32
    %c0_i32_0 = arith.constant 0 : i32
    return %arg0, %c0_i32 : i32, i32
  }
  func.func @transform_1(%arg0: i32) -> (i32, i32) {
    %c0_i32 = arith.constant 0 : i32
    %c0_i32_0 = arith.constant 0 : i32
    return %arg0, %c0_i32 : i32, i32
  }
  func.func @transform_2(%arg0: i32) -> (i32, i32) {
    %c0_i32 = arith.constant 0 : i32
    %c0_i32_0 = arith.constant 0 : i32
    return %arg0, %c0_i32 : i32, i32
  }
  func.func @transform_3(%arg0: i32) -> (i32, i32, i32) {
    %c0_i32 = arith.constant 0 : i32
    %c0_i32_0 = arith.constant 0 : i32
    %c0_i32_1 = arith.constant 0 : i32
    return %arg0, %c0_i32, %c0_i32_0 : i32, i32, i32
  }
}

</mosaic_0001>

<bundles_post_ra>
// kernel: tpu_custom_call.1
= control target key start
LH: loop header
LB: loop body
LE: loop exit
PB: predicated region body
PF: predicated region fallthrough
CT: control target
= control target key end

     0   :  { %8 = vsyncpa [#allocation3], 0  ;;  %s366_s0 = inlined_call_operand.hbm [shape: f32[8,16], index: 0, kind: input, shape index: {}]   ;;  %s367_s1 = inlined_call_operand.hbm [shape: f32[8,16], index: 1, kind: input, shape index: {}]   ;;  %s368_s2 = inlined_call_operand.hbm [shape: f32[8,16], index: 2, kind: input, shape index: {}]   ;;  %s369_s3 = inlined_call_operand.hbm [shape: f32[1,8,128], index: 3, kind: output, shape index: {}]  }
   0x1   :  { %9 = vsyncpa [#allocation6], 0 }
   0x2   :  { %10 = vsyncpa [#allocation4], 0  ;;  %s287_s12 = smov [#allocation5]   ;;  %s288_s14 = smov [#allocation2]  }
   0x3   :  { %s27_s13 = sshll.u32 %s287_s12, 4  ;;  %s17_s15 = sshll.u32 %s288_s14, 4  ;;  %s28_s13 = int_to_ptr.vmem [resolvable:$true] %s27_s13  ;;  %s18_s15 = int_to_ptr.vmem [resolvable:$true] %s17_s15 }
   0x4   :  { %s193_s18 = scalar_lea.hbm %s367_s1, 128 }
   0x5   :  { %p194_p0 = scmp.ne.s32.totalorder %s367_s1, %s193_s18  ;;  %p197_p1 = scmp.lt.u32.totalorder %s193_s18, %s367_s1 }
   0x7   :  { %p199_p2 = pnand %p197_p1, %p194_p0 }
   0x9   :  { %202 = shalt.err (!%p199_p2)
}
   0xa   :  { %s203_s23 = scalar_lea.vmem %s28_s13, 128  ;;  %p208_p4 = scmp.lt.s32.totalorder %s28_s13, %s28_s13 }
   0xb   :  { %p204_p3 = scmp.ne.s32.totalorder %s28_s13, %s203_s23  ;;  %p209_p5 = scmp.lt.s32.totalorder %s203_s23, %s203_s23 }
   0xd   :  { %p210_p6 = por %p209_p5, %p208_p4 }
   0xf   :  { %p211_p7 = pnand %p210_p6, %p204_p3 }
  0x11   :  { %214 = shalt.err (!%p211_p7)
}
  0x12   :  { %30 = dma.hbm_to_vmem [thread:$0]  %s367_s1, 128, %s28_s13, [#allocation6]  }
  0x13   :  { %s215_s28 = scalar_lea.hbm %s366_s0, 128 }
  0x14   :  { %p216_p8 = scmp.ne.s32.totalorder %s366_s0, %s215_s28  ;;  %p219_p9 = scmp.lt.u32.totalorder %s215_s28, %s366_s0 }
  0x16   :  { %p221_p10 = pnand %p219_p9, %p216_p8 }
  0x18   :  { %224 = shalt.err (!%p221_p10)
}
  0x19   :  { %s225_s6 = scalar_lea.vmem %s18_s15, 128  ;;  %p230_p12 = scmp.lt.s32.totalorder %s18_s15, %s18_s15 }
  0x1a   :  { %p226_p11 = scmp.ne.s32.totalorder %s18_s15, %s225_s6  ;;  %p231_p13 = scmp.lt.s32.totalorder %s225_s6, %s225_s6 }
  0x1c   :  { %p232_p0 = por %p231_p13, %p230_p12 }
  0x1e   :  { %p233_p1 = pnand %p232_p0, %p226_p11 }
  0x20   :  { %236 = shalt.err (!%p233_p1)
}
  0x21   :  { %20 = dma.hbm_to_vmem [thread:$0]  %s366_s0, 128, %s18_s15, [#allocation3]  }
  0x22   :  { %s289_s8 = smov [#allocation7]   ;;  %s237_s12 = scalar_lea.hbm %s368_s2, 128 }
  0x23   :  { %s37_s9 = sshll.u32 %s289_s8, 4  ;;  %p238_p2 = scmp.ne.s32.totalorder %s368_s2, %s237_s12  ;;  %s38_s9 = int_to_ptr.vmem [resolvable:$true] %s37_s9 }
  0x24   :  { %p241_p3 = scmp.lt.u32.totalorder %s237_s12, %s368_s2 }
  0x26   :  { %p243_p4 = pnand %p241_p3, %p238_p2 }
  0x28   :  { %246 = shalt.err (!%p243_p4)
}
  0x29   :  { %s247_s18 = scalar_lea.vmem %s38_s9, 128  ;;  %p252_p6 = scmp.lt.s32.totalorder %s38_s9, %s38_s9 }
  0x2a   :  { %p248_p5 = scmp.ne.s32.totalorder %s38_s9, %s247_s18  ;;  %p253_p7 = scmp.lt.s32.totalorder %s247_s18, %s247_s18 }
  0x2c   :  { %p254_p8 = por %p253_p7, %p252_p6 }
  0x2e   :  { %p255_p9 = pnand %p254_p8, %p248_p5 }
  0x30   :  { %258 = shalt.err (!%p255_p9)
}
  0x31   :  { %40 = dma.hbm_to_vmem [thread:$0]  %s368_s2, 128, %s38_s9, [#allocation6]  }
  0x32   :  { %281 = dma.done.wait [#allocation3], 128  }
  0x33   :  { %282 = vsyncadd [#allocation3], 4294967168 }
  0x34   :  { %283 = dma.done.wait [#allocation6], 256  }
  0x35   :  { %284 = vsyncadd [#allocation6], 4294967040  ;;  %v51_v0 = vld [vmem:[#allocation5] sm:$0xff]  ;;  %v50_v1 = vld [vmem:[#allocation2] sm:$0xff]  ;;  %s290_s19 = smov 1   ;;  %vm55_vm0 = vcmask 130048   ;;  %v146_v63 = vlaneseq }
  0x36   :  { %88 = vrot.lane.b32.xlu0 %v51_v0, %s290_s19  ;;  %v53_v2 = vsub.f32 %v50_v1, %v51_v0  ;;  %v52_v5 = vld [vmem:[#allocation7] sm:$0xff]  ;;  %s291_s2 = smov 127   ;;  %v292_v13 = vmov 0.0   ;;  %vm76_vm2 = vcmask 121856   ;;  %vm110_vm3 = vcmask 113664   ;;  %s293_s24 = smov [#allocation8]  }
  0x37   :  { %v121_v6 = vsub.f32 %v52_v5, %v51_v0  ;;  %s167_s25 = sshll.u32 %s293_s24, 4  ;;  %s168_s25 = int_to_ptr.vmem [resolvable:$true] %s167_s25 }
  0x38   :  { %67 = vrot.lane.b32.xlu1 %v53_v2, %s290_s19  ;;  %v54_v15 = vmul.f32 %v53_v2, %v53_v2  ;;  %s259_s26 = scalar_lea.vmem %s168_s25, 128  ;;  %p264_p11 = scmp.lt.s32.totalorder %s168_s25, %s168_s25 }
  0x39   :  { %v123_v7 = vsel %vm55_vm0, %v121_v6, 0.0  ;;  %v122_v16 = vmul.f32 %v121_v6, %v121_v6  ;;  %p260_p10 = scmp.ne.s32.totalorder %s168_s25, %s259_s26  ;;  %p265_p12 = scmp.lt.s32.totalorder %s259_s26, %s259_s26 }
  0x3a   :  { %v56_v17 = vsel %vm55_vm0, %v54_v15, 0.0 }
  0x3b   :  { %v126_v18 = vsel %vm55_vm0, %v122_v16, 0.0  ;;  %p266_p13 = por %p265_p12, %p264_p11 }
  0x3d   :  { %p267_p0 = pnand %p266_p13, %p260_p10 }
  0xa8   :  { %v89_v3 = vpop.permute.xlu0 %88 }
  0xa9   :  { %v91_v4 = vsub.f32 %v51_v0, %v89_v3  ;;  %v147_v0 = vand.u32 127, %v146_v63 }
  0xaa   :  { %v68_v8 = vpop.permute.xlu1 %67 }
  0xab   :  { %93 = vrot.lane.b32.xlu0 %v91_v4, %s290_s19  ;;  %v70_v9 = vsub.f32 %v53_v2, %v68_v8  ;;  %vm151_vm4 = vcmp.eq.s32.totalorder %v147_v0, 3  ;;  %vm150_vm5 = vcmp.eq.s32.totalorder %v147_v0, 2  ;;  %vm149_vm6 = vcmp.eq.s32.totalorder %v147_v0, 1 }
  0xac   :  { %vm148_vm7 = vcmp.eq.s32.totalorder %v147_v0, 0 }
  0xad   :  { %v71_v10 = vand.u32 2147483647, %v70_v9 }
  0xca   :  { %124 = vadd.xlane.f32.xlu0 %v123_v7 }
  0xe0   :  { %73 = vrot.lane.b32.xlu0 %v71_v10, %s291_s2 }
  0xff   :  { %57 = vadd.xlane.f32.xlu0 %v56_v17 }
 0x11d   :  { %v94_v11 = vpop.permute.xlu0 %93 }
 0x11e   :  { %v96_v12 = vsub.f32 %v91_v4, %v94_v11 }
 0x120   :  { %vm97_vm1 = vcmp.lt.f32.partialorder %v96_v12, 0.0 }
 0x121   :  { %v177_v14 = vsel %vm97_vm1, 1.0, %v292_v13 }
 0x122   :  { %101 = vrot.lane.b32.xlu1 %v177_v14, %s291_s2 }
 0x146   :  { %127 = vadd.xlane.f32.xlu1 %v126_v18 }
 0x157   :  { %v125_v22 = vpop.xlane.xlu0 %124 }
 0x158   :  { %v129_v25 = vmul.f32 %v125_v22, %v125_v22 }
 0x15a   :  { %v130_v26 = vmul.f32 0.0625, %v129_v25 }
 0x15b   :  { %v74_v23 = vpop.permute.xlu0 %73 }
 0x15c   :  { %v77_v24 = vsel %vm76_vm2, %v74_v23, 0.0 }
 0x18c   :  { %v58_v31 = vpop.xlane.xlu0 %57 }
 0x18d   :  { %v59_v34 = vrot.slane %v58_v31, 4 }
 0x18f   :  { %v60_v37 = vadd.f32 %v59_v34, %v58_v31 }
 0x191   :  { %v61_v38 = vrot.slane %v60_v37, 2 }
 0x193   :  { %v62_v39 = vadd.f32 %v61_v38, %v60_v37 }
 0x194   :  { %v102_v19 = vpop.permute.xlu1 %101 }
 0x195   :  { %v104_v20 = vmul.f32 %v102_v19, %v53_v2  ;;  %v63_v40 = vrot.slane %v62_v39, 1 }
 0x197   :  { %v105_v21 = vmul.f32 %v104_v20, %v104_v20  ;;  %v64_v41 = vadd.f32 %v63_v40, %v62_v39 }
 0x199   :  { %107 = vrot.lane.b32.xlu1 %v105_v21, %s291_s2  ;;  %178 = vpush %v64_v41 }
 0x1bd   :  { %78 = vadd.xlane.f32.xlu1 %v77_v24 }
 0x1ca   :  { %s179_s20 = spop %178 }
 0x1cb   :  { %v158_v6 = vstv %s179_s20 }
 0x1d3   :  { %v128_v27 = vpop.xlane.xlu1 %127 }
 0x1d4   :  { %v131_v28 = vsub.f32 %v128_v27, %v130_v26 }
 0x1d6   :  { %v133_v29 = vmul.f32 0.06666667, %v131_v28 }
 0x1d8   :  { %v134_v30 = vsub.f32 %v122_v16, %v133_v29 }
 0x1da   :  { %v135_v32 = vmul.f32 %v134_v30, %v134_v30 }
 0x1dc   :  { %v136_v36 = vsel %vm55_vm0, %v135_v32, 0.0 }
 0x20b   :  { %v108_v33 = vpop.permute.xlu1 %107 }
 0x20c   :  { %v111_v35 = vsel %vm110_vm3, %v108_v33, 0.0 }
 0x20d   :  { %112 = vadd.xlane.f32.xlu0 %v111_v35 }
 0x211   :  { %137 = vadd.xlane.f32.xlu0 %v136_v36 }
 0x24a   :  { %v79_v42 = vpop.xlane.xlu1 %78 }
 0x24b   :  { %v80_v43 = vrot.slane %v79_v42, 4 }
 0x24d   :  { %v81_v44 = vadd.f32 %v80_v43, %v79_v42 }
 0x24f   :  { %v82_v45 = vrot.slane %v81_v44, 2 }
 0x251   :  { %v83_v46 = vadd.f32 %v82_v45, %v81_v44 }
 0x253   :  { %v84_v47 = vrot.slane %v83_v46, 1 }
 0x255   :  { %v85_v48 = vadd.f32 %v84_v47, %v83_v46 }
 0x257   :  { %180 = vpush %v85_v48 }
 0x288   :  { %s181_s21 = spop %180 }
 0x289   :  { %v156_v4 = vstv %s181_s21 }
 0x29a   :  { %v113_v49 = vpop.xlane.xlu0 %112 }
 0x29b   :  { %v114_v50 = vrot.slane %v113_v49, 4 }
 0x29d   :  { %v115_v51 = vadd.f32 %v114_v50, %v113_v49 }
 0x29e   :  { %v138_v52 = vpop.xlane.xlu0 %137 }
 0x29f   :  { %v116_v53 = vrot.slane %v115_v51, 2  ;;  %v139_v54 = vrot.slane %v138_v52, 4 }
 0x2a1   :  { %v140_v55 = vadd.f32 %v139_v54, %v138_v52  ;;  %v117_v56 = vadd.f32 %v116_v53, %v115_v51 }
 0x2a3   :  { %v141_v57 = vrot.slane %v140_v55, 2  ;;  %v118_v58 = vrot.slane %v117_v56, 1 }
 0x2a5   :  { %v142_v59 = vadd.f32 %v141_v57, %v140_v55  ;;  %v119_v60 = vadd.f32 %v118_v58, %v117_v56 }
 0x2a7   :  { %182 = vpush %v119_v60  ;;  %v143_v61 = vrot.slane %v142_v59, 1 }
 0x2a9   :  { %v144_v62 = vadd.f32 %v143_v61, %v142_v59 }
 0x2ab   :  { %184 = vpush %v144_v62 }
 0x2d8   :  { %s183_s22 = spop %182 }
 0x2d9   :  { %v154_v2 = vstv %s183_s22 }
 0x2dc   :  { %s185_s23 = spop %184 }
 0x2dd   :  { %v152_v1 = vstv %s185_s23 }
 0x2de   :  { %v153_v3 = vsel %vm151_vm4, %v152_v1, 0.0 }
 0x2df   :  { %v155_v5 = vsel %vm150_vm5, %v154_v2, %v153_v3 }
 0x2e0   :  { %v157_v7 = vsel %vm149_vm6, %v156_v4, %v155_v5 }
 0x2e1   :  { %v159_v8 = vsel %vm148_vm7, %v158_v6, %v157_v7 }
 0x2e2   :  { %160 = vst [vmem:[#allocation8] sm:$0xff] %v159_v8 }
 0x2e3   :  { %270 = shalt.err (!%p267_p0)
}
 0x2e4   :  { %s271_s29 = scalar_lea.hbm %s369_s3, 128 }
 0x2e5   :  { %p272_p1 = scmp.ne.s32.totalorder %s369_s3, %s271_s29  ;;  %p275_p2 = scmp.lt.u32.totalorder %s271_s29, %s369_s3 }
 0x2e7   :  { %p277_p3 = pnand %p275_p2, %p272_p1 }
 0x2e9   :  { %280 = shalt.err (!%p277_p3)
}
 0x2ea   :  { %170 = dma.vmem_to_hbm [thread:$0]  %s168_s25, 128, %s369_s3, [#allocation4]  }
 0x2eb   :  { %285 = dma.done.wait [#allocation4], 128  }
 0x2ec   :  { %286 = vsyncadd [#allocation4], 4294967168 }
 0x2ed   :  { %174 = vsyncpa [#allocation3], 1 }
 0x2ee   :  { %175 = vsyncpa [#allocation6], 1 }
 0x2ef   :  { %176 = vsyncpa [#allocation4], 1 }

</bundles_post_ra>
